<compile_context>
chip_gen: v7x
topology: tpu7x:2x2x1
jax: 0.10.0
libtpu: 0.0.40
codegen_flags: <defaults>
</compile_context>

<pallas_src>
import jax
import jax.numpy as jnp
from jax.experimental import pallas as pl
from jax.experimental.pallas import tpu as pltpu

N_PAD = 128  # lane-dense padding for the 2-wide classifier output


def _mlp_kernel(tw_ref, de_ref, w13_ref, b13_ref, w4_ref, b4_ref, o_ref):
    # bf16 MXU datapath, f32 accumulation.
    tw = tw_ref[...].astype(jnp.bfloat16)
    de = de_ref[...].astype(jnp.bfloat16)

    # Fused Linear1/Linear2/Linear3:
    #   concat([tw@W1+b1, de@W2+b2]) @ W3 + b3
    #     == tw @ (W1@W3a) + de @ (W2@W3b) + (b1@W3a + b2@W3b + b3)
    pre = (jnp.dot(tw, w13_ref[0], preferred_element_type=jnp.float32)
           + jnp.dot(de, w13_ref[1], preferred_element_type=jnp.float32)
           + b13_ref[...])

    # LeakyReLU (negative_slope = 0.01) -- single VPU max, kept in f32.
    h = jnp.maximum(pre, 0.01 * pre)

    # TODO(synk): Dropout(p=0.3) is identity here (inference semantics).

    # Classifier, padded to 128 output lanes for unmasked stores.
    out = jnp.dot(h.astype(jnp.bfloat16), w4_ref[...],
                  preferred_element_type=jnp.float32) + b4_ref[...]
    o_ref[...] = out.astype(o_ref.dtype)


def mlp_classifier_forward(tweet, des, fused_params):
    """Whole forward pass in one Pallas program, batch-tiled along rows."""
    w13, b13, w4p, b4p, out_dim = fused_params
    B, input_dim = tweet.shape
    hidden = w13.shape[-1]

    # Batch tile: multiple of 8 sublanes (or the full array when B is small).
    block_b = min(B, 256)
    grid = (pl.cdiv(B, block_b),)

    in_specs = [
        pl.BlockSpec((block_b, input_dim), lambda i: (i, 0)),       # tweet rows
        pl.BlockSpec((block_b, input_dim), lambda i: (i, 0)),       # des rows
        pl.BlockSpec((2, input_dim, hidden), lambda i: (0, 0, 0)),  # fused W13 (resident)
        pl.BlockSpec((1, hidden), lambda i: (0, 0)),                # fused b13 (resident)
        pl.BlockSpec((hidden, N_PAD), lambda i: (0, 0)),            # padded W4 (resident)
        pl.BlockSpec((1, N_PAD), lambda i: (0, 0)),                 # padded b4 (resident)
    ]
    out_specs = pl.BlockSpec((block_b, N_PAD), lambda i: (i, 0))

    out_padded = pl.pallas_call(
        _mlp_kernel,
        out_shape=jax.ShapeDtypeStruct((B, N_PAD), jnp.float32),
        grid_spec=pltpu.PrefetchScalarGridSpec(
            num_scalar_prefetch=0,
            grid=grid,
            in_specs=in_specs,
            out_specs=out_specs,
        ),
        compiler_params=pltpu.CompilerParams(
            dimension_semantics=("parallel",)),
    )(tweet, des, w13, b13, w4p, b4p)

    return out_padded[:, :out_dim]


def init_params(key, input_dim, hidden_dim, out_dim=2):
    """nn.Linear-style U(-1/sqrt(fan_in), 1/sqrt(fan_in)) init.
    Weights stored as (in_features, out_features) for x @ W."""
    def linear(k, fan_in, fan_out):
        kw, kb = jax.random.split(k)
        bound = 1.0 / jnp.sqrt(jnp.float32(fan_in))
        w = jax.random.uniform(kw, (fan_in, fan_out), jnp.float32, -bound, bound)
        b = jax.random.uniform(kb, (1, fan_out), jnp.float32, -bound, bound)
        return w, b

    k1, k2, k3, k4 = jax.random.split(key, 4)
    half = input_dim // 2
    w1, b1 = linear(k1, input_dim, half)          # pre_model1
    w2, b2 = linear(k2, input_dim, half)          # pre_model2
    w3, b3 = linear(k3, input_dim, hidden_dim)    # linear_relu_tweet[0]
    w4, b4 = linear(k4, hidden_dim, out_dim)      # classifier
    return (w1, b1, w2, b2, w3, b3, w4, b4)


def fuse_params(params):
    """Offline algebraic fusion of Linear1/Linear2 into Linear3 + lane-padding
    of the classifier; weights cast to bf16, biases kept f32."""
    (w1, b1, w2, b2, w3, b3, w4, b4) = params
    half = w1.shape[1]
    w3a, w3b = w3[:half, :], w3[half:, :]
    w13a = w1 @ w3a                               # (input_dim, hidden)
    w13b = w2 @ w3b                               # (input_dim, hidden)
    b13 = b1 @ w3a + b2 @ w3b + b3                # (1, hidden)
    w13 = jnp.stack([w13a, w13b], axis=0).astype(jnp.bfloat16)

    hidden, out_dim = w4.shape
    w4p = jnp.zeros((hidden, N_PAD), jnp.float32).at[:, :out_dim].set(w4)
    b4p = jnp.zeros((1, N_PAD), jnp.float32).at[:, :out_dim].set(b4)
    return (w13, b13.astype(jnp.float32),
            w4p.astype(jnp.bfloat16), b4p.astype(jnp.float32), out_dim)


if __name__ == "__main__":
    # Small shapes consistent with the module (input_dim even, hidden_dim=128).
    B, INPUT_DIM, HIDDEN_DIM = 8, 256, 128

    key = jax.random.PRNGKey(0)
    k_tw, k_de, k_p = jax.random.split(key, 3)
    tweet = jax.random.normal(k_tw, (B, INPUT_DIM), jnp.float32)
    des = jax.random.normal(k_de, (B, INPUT_DIM), jnp.float32)

    raw = init_params(k_p, INPUT_DIM, HIDDEN_DIM)
    fused = fuse_params(raw)

    out = mlp_classifier_forward(tweet, des, fused)
    jax.block_until_ready(out)
    assert out.shape == (B, 2)

    # 1) Tight check: pure-JAX reference with the exact same fused/bf16 math.
    w13, b13, w4p, b4p, out_dim = fused
    tw = tweet.astype(jnp.bfloat16)
    de = des.astype(jnp.bfloat16)
    pre = (jnp.dot(tw, w13[0], preferred_element_type=jnp.float32)
           + jnp.dot(de, w13[1], preferred_element_type=jnp.float32) + b13)
    h = jnp.maximum(pre, 0.01 * pre)
    ref_tight = (jnp.dot(h.astype(jnp.bfloat16), w4p,
                         preferred_element_type=jnp.float32) + b4p)[:, :out_dim]
    assert jnp.allclose(out, ref_tight, atol=5e-3, rtol=5e-3)

    # 2) Loose check: original un-fused f32 module math (validates the fusion).
    (w1, b1, w2, b2, w3, b3, w4, b4) = raw
    pre1 = tweet @ w1 + b1
    pre2 = des @ w2 + b2
    x = jnp.concatenate([pre1, pre2], axis=1)
    hh = x @ w3 + b3
    hh = jnp.where(hh > 0, hh, 0.01 * hh)
    ref_full = hh @ w4 + b4
    assert jnp.allclose(out, ref_full, atol=5e-2, rtol=5e-2)

    print("KERNEL_OK")
</pallas_src>

<mosaic_0001>
module attributes {stable_mosaic.version = 11 : i64} {
  func.func @_mlp_kernel(%arg0: i32, %arg1: memref<8x256xf32, #tpu.memory_space<vmem>>, %arg2: memref<8x256xf32, #tpu.memory_space<vmem>>, %arg3: memref<2x256x128xbf16, #tpu.memory_space<vmem>>, %arg4: memref<1x128xf32, #tpu.memory_space<vmem>>, %arg5: memref<128x128xbf16, #tpu.memory_space<vmem>>, %arg6: memref<1x128xf32, #tpu.memory_space<vmem>>, %arg7: memref<8x128xf32, #tpu.memory_space<vmem>>) attributes {dimension_semantics = [#tpu.dimension_semantics<parallel>], iteration_bounds = array<i64: 1>, scalar_prefetch = 0 : i64, scratch_operands = 0 : i64, tpu.core_type = #tpu.core_type<tc>, window_params = [{transform_indices = @transform_0, window_bounds = array<i64: 8, 256>}, {transform_indices = @transform_1, window_bounds = array<i64: 8, 256>}, {pipeline_mode = #tpu.pipeline_mode<synchronous>, transform_indices = @transform_2, window_bounds = array<i64: 2, 256, 128>}, {pipeline_mode = #tpu.pipeline_mode<synchronous>, transform_indices = @transform_3, window_bounds = array<i64: 1, 128>}, {pipeline_mode = #tpu.pipeline_mode<synchronous>, transform_indices = @transform_4, window_bounds = array<i64: 128, 128>}, {pipeline_mode = #tpu.pipeline_mode<synchronous>, transform_indices = @transform_5, window_bounds = array<i64: 1, 128>}, {transform_indices = @transform_6, window_bounds = array<i64: 8, 128>}]} {
    %c0 = arith.constant 0 : index
    %c0_0 = arith.constant 0 : index
    %0 = vector.load %arg1[%c0, %c0_0] : memref<8x256xf32, #tpu.memory_space<vmem>>, vector<8x256xf32>
    %1 = arith.truncf %0 : vector<8x256xf32> to vector<8x256xbf16>
    %c0_1 = arith.constant 0 : index
    %c0_2 = arith.constant 0 : index
    %2 = vector.load %arg2[%c0_1, %c0_2] : memref<8x256xf32, #tpu.memory_space<vmem>>, vector<8x256xf32>
    %3 = arith.truncf %2 : vector<8x256xf32> to vector<8x256xbf16>
    %c0_3 = arith.constant 0 : index
    %c0_4 = arith.constant 0 : index
    %c0_5 = arith.constant 0 : index
    %4 = vector.load %arg3[%c0_3, %c0_4, %c0_5] : memref<2x256x128xbf16, #tpu.memory_space<vmem>>, vector<1x256x128xbf16>
    %5 = vector.shape_cast %4 : vector<1x256x128xbf16> to vector<256x128xbf16>
    %cst = arith.constant dense<0.000000e+00> : vector<8x128xf32>
    %6 = tpu.matmul %1, %5, %cst {dimension_numbers = #tpu.dot_dimension_numbers<[1], [0], [0], [1], [0, 0, 1, 1], [], []>} : vector<8x256xbf16>, vector<256x128xbf16>, vector<8x128xf32> -> vector<8x128xf32>
    %c1 = arith.constant 1 : index
    %c0_6 = arith.constant 0 : index
    %c0_7 = arith.constant 0 : index
    %7 = vector.load %arg3[%c1, %c0_6, %c0_7] : memref<2x256x128xbf16, #tpu.memory_space<vmem>>, vector<1x256x128xbf16>
    %8 = vector.shape_cast %7 : vector<1x256x128xbf16> to vector<256x128xbf16>
    %cst_8 = arith.constant dense<0.000000e+00> : vector<8x128xf32>
    %9 = tpu.matmul %3, %8, %cst_8 {dimension_numbers = #tpu.dot_dimension_numbers<[1], [0], [0], [1], [0, 0, 1, 1], [], []>} : vector<8x256xbf16>, vector<256x128xbf16>, vector<8x128xf32> -> vector<8x128xf32>
    %10 = arith.addf %6, %9 : vector<8x128xf32>
    %c0_9 = arith.constant 0 : index
    %c0_10 = arith.constant 0 : index
    %11 = vector.load %arg4[%c0_9, %c0_10] : memref<1x128xf32, #tpu.memory_space<vmem>>, vector<1x128xf32>
    %12 = vector.broadcast %11 : vector<1x128xf32> to vector<8x128xf32>
    %13 = arith.addf %10, %12 : vector<8x128xf32>
    %cst_11 = arith.constant 0.00999999977 : f32
    %14 = vector.broadcast %cst_11 : f32 to vector<8x128xf32>
    %15 = arith.mulf %14, %13 : vector<8x128xf32>
    %16 = arith.maximumf %13, %15 : vector<8x128xf32>
    %17 = arith.truncf %16 : vector<8x128xf32> to vector<8x128xbf16>
    %c0_12 = arith.constant 0 : index
    %c0_13 = arith.constant 0 : index
    %18 = vector.load %arg5[%c0_12, %c0_13] : memref<128x128xbf16, #tpu.memory_space<vmem>>, vector<128x128xbf16>
    %cst_14 = arith.constant dense<0.000000e+00> : vector<8x128xf32>
    %19 = tpu.matmul %17, %18, %cst_14 {dimension_numbers = #tpu.dot_dimension_numbers<[1], [0], [0], [1], [0, 0, 1, 1], [], []>} : vector<8x128xbf16>, vector<128x128xbf16>, vector<8x128xf32> -> vector<8x128xf32>
    %c0_15 = arith.constant 0 : index
    %c0_16 = arith.constant 0 : index
    %20 = vector.load %arg6[%c0_15, %c0_16] : memref<1x128xf32, #tpu.memory_space<vmem>>, vector<1x128xf32>
    %21 = vector.broadcast %20 : vector<1x128xf32> to vector<8x128xf32>
    %22 = arith.addf %19, %21 : vector<8x128xf32>
    %c0_17 = arith.constant 0 : index
    %c0_18 = arith.constant 0 : index
    %23 = vector.load %arg7[%c0_17, %c0_18] : memref<8x128xf32, #tpu.memory_space<vmem>>, vector<8x128xf32>
    tpu.vector_store %arg7[%c0_17, %c0_18], %22 {strides = array<i32>} : memref<8x128xf32, #tpu.memory_space<vmem>>, vector<8x128xf32>,
    return
  }
  func.func @transform_0(%arg0: i32) -> (i32, i32) {
    %c0_i32 = arith.constant 0 : i32
    %c0_i32_0 = arith.constant 0 : i32
    return %arg0, %c0_i32 : i32, i32
  }
  func.func @transform_1(%arg0: i32) -> (i32, i32) {
    %c0_i32 = arith.constant 0 : i32
    %c0_i32_0 = arith.constant 0 : i32
    return %arg0, %c0_i32 : i32, i32
  }
  func.func @transform_2(%arg0: i32) -> (i32, i32, i32) {
    %c0_i32 = arith.constant 0 : i32
    %c0_i32_0 = arith.constant 0 : i32
    %c0_i32_1 = arith.constant 0 : i32
    %c0_i32_2 = arith.constant 0 : i32
    return %c0_i32, %c0_i32_0, %c0_i32_1 : i32, i32, i32
  }
  func.func @transform_3(%arg0: i32) -> (i32, i32) {
    %c0_i32 = arith.constant 0 : i32
    %c0_i32_0 = arith.constant 0 : i32
    %c0_i32_1 = arith.constant 0 : i32
    return %c0_i32, %c0_i32_0 : i32, i32
  }
  func.func @transform_4(%arg0: i32) -> (i32, i32) {
    %c0_i32 = arith.constant 0 : i32
    %c0_i32_0 = arith.constant 0 : i32
    %c0_i32_1 = arith.constant 0 : i32
    return %c0_i32, %c0_i32_0 : i32, i32
  }
  func.func @transform_5(%arg0: i32) -> (i32, i32) {
    %c0_i32 = arith.constant 0 : i32
    %c0_i32_0 = arith.constant 0 : i32
    %c0_i32_1 = arith.constant 0 : i32
    return %c0_i32, %c0_i32_0 : i32, i32
  }
  func.func @transform_6(%arg0: i32) -> (i32, i32) {
    %c0_i32 = arith.constant 0 : i32
    %c0_i32_0 = arith.constant 0 : i32
    return %arg0, %c0_i32 : i32, i32
  }
}

</mosaic_0001>

<bundles_post_ra>
// kernel: tpu_custom_call.1
= control target key start
LH: loop header
LB: loop body
LE: loop exit
PB: predicated region body
PF: predicated region fallthrough
CT: control target
= control target key end

     0   :  { %11 = vsyncpa [#allocation3], 0  ;;  %s953_s0 = inlined_call_operand.hbm [shape: f32[8,256], index: 0, kind: input, shape index: {}]   ;;  %s954_s1 = inlined_call_operand.hbm [shape: f32[8,256], index: 1, kind: input, shape index: {}]   ;;  %s955_s2 = inlined_call_operand.hbm [shape: bf16[2,256,128], index: 2, kind: input, shape index: {}]   ;;  %s956_s3 = inlined_call_operand.vmem [shape: f32[1,128], index: 3, kind: input, shape index: {}]   ;;  %s957_s4 = inlined_call_operand.hbm [shape: bf16[128,128], index: 4, kind: input, shape index: {}]   ;;  %s958_s5 = inlined_call_operand.vmem [shape: f32[1,128], index: 5, kind: input, shape index: {}]   ;;  %s959_s6 = inlined_call_operand.hbm [shape: f32[8,128], index: 6, kind: output, shape index: {}]  }
   0x1   :  { %12 = vsyncpa [#allocation6], 0 }
   0x2   :  { %13 = vsyncpa [#allocation9], 0 }
   0x3   :  { %14 = vsyncpa [#allocation4], 0  ;;  %s843_s21 = smov [#allocation5]   ;;  %s844_s23 = smov [#allocation2]  }
   0x4   :  { %s31_s22 = sshll.u32 %s843_s21, 4  ;;  %s21_s24 = sshll.u32 %s844_s23, 4  ;;  %s32_s22 = int_to_ptr.vmem [resolvable:$true] %s31_s22  ;;  %s22_s24 = int_to_ptr.vmem [resolvable:$true] %s21_s24 }
   0x5   :  { %s725_s27 = scalar_lea.hbm %s954_s1, 256 }
   0x6   :  { %p726_p0 = scmp.ne.s32.totalorder %s954_s1, %s725_s27  ;;  %p729_p1 = scmp.lt.u32.totalorder %s725_s27, %s954_s1 }
   0x8   :  { %p731_p2 = pnand %p729_p1, %p726_p0 }
   0xa   :  { %734 = shalt.err (!%p731_p2)
}
   0xb   :  { %s735_s8 = scalar_lea.vmem %s32_s22, 256  ;;  %p740_p4 = scmp.lt.s32.totalorder %s32_s22, %s32_s22 }
   0xc   :  { %p736_p3 = scmp.ne.s32.totalorder %s32_s22, %s735_s8  ;;  %p741_p5 = scmp.lt.s32.totalorder %s735_s8, %s735_s8 }
   0xe   :  { %p742_p6 = por %p741_p5, %p740_p4 }
  0x10   :  { %p743_p7 = pnand %p742_p6, %p736_p3 }
  0x12   :  { %746 = shalt.err (!%p743_p7)
}
  0x13   :  { %34 = dma.hbm_to_vmem [thread:$0]  %s954_s1, 256, %s32_s22, [#allocation6]  }
  0x14   :  { %s747_s13 = scalar_lea.hbm %s953_s0, 256 }
  0x15   :  { %p748_p8 = scmp.ne.s32.totalorder %s953_s0, %s747_s13  ;;  %p751_p9 = scmp.lt.u32.totalorder %s747_s13, %s953_s0 }
  0x17   :  { %p753_p10 = pnand %p751_p9, %p748_p8 }
  0x19   :  { %756 = shalt.err (!%p753_p10)
}
  0x1a   :  { %s757_s18 = scalar_lea.vmem %s22_s24, 256  ;;  %p762_p12 = scmp.lt.s32.totalorder %s22_s24, %s22_s24 }
  0x1b   :  { %p758_p11 = scmp.ne.s32.totalorder %s22_s24, %s757_s18  ;;  %p763_p13 = scmp.lt.s32.totalorder %s757_s18, %s757_s18 }
  0x1d   :  { %p764_p0 = por %p763_p13, %p762_p12 }
  0x1f   :  { %p765_p1 = pnand %p764_p0, %p758_p11 }
  0x21   :  { %768 = shalt.err (!%p765_p1)
}
  0x22   :  { %24 = dma.hbm_to_vmem [thread:$0]  %s953_s0, 256, %s22_s24, [#allocation3]  }
  0x23   :  { %s845_s20 = smov [#allocation7]   ;;  %s769_s25 = scalar_lea.hbm %s955_s2, 4096 }
  0x24   :  { %s40_s21 = sshll.u32 %s845_s20, 4  ;;  %p770_p2 = scmp.ne.s32.totalorder %s955_s2, %s769_s25  ;;  %s41_s21 = int_to_ptr.vmem [resolvable:$true] %s40_s21 }
  0x25   :  { %p773_p3 = scmp.lt.u32.totalorder %s769_s25, %s955_s2 }
  0x27   :  { %p775_p4 = pnand %p773_p3, %p770_p2 }
  0x29   :  { %778 = shalt.err (!%p775_p4)
}
  0x2a   :  { %s779_s30 = scalar_lea.vmem %s41_s21, 4096  ;;  %p784_p6 = scmp.lt.s32.totalorder %s41_s21, %s41_s21 }
  0x2b   :  { %p780_p5 = scmp.ne.s32.totalorder %s41_s21, %s779_s30  ;;  %p785_p7 = scmp.lt.s32.totalorder %s779_s30, %s779_s30 }
  0x2d   :  { %p786_p8 = por %p785_p7, %p784_p6 }
  0x2f   :  { %p787_p9 = pnand %p786_p8, %p780_p5 }
  0x31   :  { %790 = shalt.err (!%p787_p9)
}
  0x32   :  { %s846_s0 = smov 64   ;;  %s847_s24 = smov 4  }
  0x33   :  { %46 = dma.hbm_to_vmem [thread:$0]  %s955_s2, 4096, %s41_s21, [#allocation6], %s846_s0, %s846_s0, %s847_s24  }
  0x34   :  { %s848_s9 = smov [#allocation8]   ;;  %s791_s13 = scalar_lea.hbm %s957_s4, 1024 }
  0x35   :  { %s54_s10 = sshll.u32 %s848_s9, 4  ;;  %p792_p10 = scmp.ne.s32.totalorder %s957_s4, %s791_s13  ;;  %s55_s10 = int_to_ptr.vmem [resolvable:$true] %s54_s10 }
  0x36   :  { %p795_p11 = scmp.lt.u32.totalorder %s791_s13, %s957_s4 }
  0x38   :  { %p797_p12 = pnand %p795_p11, %p792_p10 }
  0x3a   :  { %800 = shalt.err (!%p797_p12)
}
  0x3b   :  { %s801_s18 = scalar_lea.vmem %s55_s10, 1024  ;;  %p806_p0 = scmp.lt.s32.totalorder %s55_s10, %s55_s10 }
  0x3c   :  { %p802_p13 = scmp.ne.s32.totalorder %s55_s10, %s801_s18  ;;  %p807_p1 = scmp.lt.s32.totalorder %s801_s18, %s801_s18 }
  0x3e   :  { %p808_p2 = por %p807_p1, %p806_p0 }
  0x40   :  { %p809_p3 = pnand %p808_p2, %p802_p13 }
  0x42   :  { %812 = shalt.err (!%p809_p3)
}
  0x43   :  { %60 = dma.hbm_to_vmem [thread:$0]  %s957_s4, 1024, %s55_s10, [#allocation9], %s846_s0, %s846_s0, %s847_s24  }
  0x44   :  { %835 = dma.done.wait [#allocation3], 256  }
  0x45   :  { %836 = vsyncadd [#allocation3], 4294967040 }
  0x46   :  { %837 = dma.done.wait [#allocation6], 4352  }
  0x47   :  { %838 = vsyncadd [#allocation6], 4294962944 }
  0x48   :  { %839 = dma.done.wait [#allocation9], 1024  }
  0x49   :  { %840 = vsyncadd [#allocation9], 4294966272  ;;  %v685_v0 = vld [vmem:[#allocation7 + $0xc0] sm:$0xff]   ;;  %v689_v4 = vld [vmem:[#allocation7 + $0xc8] sm:$0xff]   ;;  %v849_v39 = vmov 0.0   ;;  %vm850_vm0 = vmmov 0  }
  0x4a   :  { %v686_v1 = vld [vmem:[#allocation7 + $0x40] sm:$0xff]   ;;  %603 = vmatprep.subr.bf16.mxu0 %v685_v0  ;;  %v690_v5 = vld [vmem:[#allocation7 + $0x48] sm:$0xff]   ;;  %v693_v8 = vld [vmem:[#allocation7 + $0xd0] sm:$0xff]   ;;  %s851_s22 = smov [#allocation10]  }
  0x4b   :  { %v687_v2 = vld [vmem:[#allocation7 + $0x80] sm:$0xff]   ;;  %625 = vmatprep.subr.bf16.mxu1 %v686_v1  ;;  %v691_v6 = vld [vmem:[#allocation7 + $0x88] sm:$0xff]   ;;  %v694_v9 = vld [vmem:[#allocation7 + $0x50] sm:$0xff]   ;;  %s550_s23 = sshll.u32 %s851_s22, 4  ;;  %s551_s23 = int_to_ptr.vmem [resolvable:$true] %s550_s23 }
  0x4c   :  { %v688_v3 = vld [vmem:[#allocation7] sm:$0xff]   ;;  %604 = vmatpush3.bf16.msra.mxu0 %v687_v2  ;;  %v692_v7 = vld [vmem:[#allocation7 + $0x8] sm:$0xff]   ;;  %v695_v10 = vld [vmem:[#allocation7 + $0x90] sm:$0xff]   ;;  %p818_p5 = scmp.lt.s32.totalorder %s551_s23, %s551_s23 }
  0x4d   :  { %626 = vmatpush3.bf16.msra.mxu1 %v688_v3  ;;  %605 = vmatprep.subr.bf16.mxu0 %v689_v4  ;;  %v696_v11 = vld [vmem:[#allocation7 + $0x10] sm:$0xff]   ;;  %v697_v12 = vld [vmem:[#allocation7 + $0xd8] sm:$0xff]   ;;  %v701_v16 = vld [vmem:[#allocation7 + $0xe0] sm:$0xff]  }
  0x4e   :  { %627 = vmatprep.subr.bf16.mxu1 %v690_v5  ;;  %v698_v13 = vld [vmem:[#allocation7 + $0x58] sm:$0xff]   ;;  %v702_v17 = vld [vmem:[#allocation7 + $0x60] sm:$0xff]   ;;  %v705_v20 = vld [vmem:[#allocation7 + $0xe8] sm:$0xff]  }
  0x4f   :  { %v699_v14 = vld [vmem:[#allocation7 + $0x98] sm:$0xff]   ;;  %v703_v18 = vld [vmem:[#allocation7 + $0xa0] sm:$0xff]   ;;  %v706_v21 = vld [vmem:[#allocation7 + $0x68] sm:$0xff]  }
  0x50   :  { %606 = vmatpush3.bf16.msra.mxu0 %v691_v6  ;;  %v700_v15 = vld [vmem:[#allocation7 + $0x18] sm:$0xff]   ;;  %v704_v19 = vld [vmem:[#allocation7 + $0x20] sm:$0xff]   ;;  %v707_v22 = vld [vmem:[#allocation7 + $0xa8] sm:$0xff]  }
  0x51   :  { %628 = vmatpush3.bf16.msra.mxu1 %v692_v7  ;;  %607 = vmatprep.subr.bf16.mxu0 %v693_v8  ;;  %v708_v23 = vld [vmem:[#allocation7 + $0x28] sm:$0xff]   ;;  %v709_v24 = vld [vmem:[#allocation7 + $0xf0] sm:$0xff]   ;;  %v713_v28 = vld [vmem:[#allocation7 + $0xf8] sm:$0xff]  }
  0x52   :  { %629 = vmatprep.subr.bf16.mxu1 %v694_v9  ;;  %v710_v25 = vld [vmem:[#allocation7 + $0x70] sm:$0xff]   ;;  %v714_v29 = vld [vmem:[#allocation7 + $0x78] sm:$0xff]   ;;  %v77_v33 = vld [vmem:[#allocation2 + $0x8] sm:$0xff] }
  0x53   :  { %v711_v26 = vld [vmem:[#allocation7 + $0xb0] sm:$0xff]   ;;  %v715_v30 = vld [vmem:[#allocation7 + $0xb8] sm:$0xff]   ;;  %v79_v36 = vpack.c.bf16 %v77_v33, %v77_v33  ;;  %v76_v38 = vld [vmem:[#allocation2] sm:$0xff] }
  0x54   :  { %608 = vmatpush3.bf16.msra.mxu0 %v695_v10  ;;  %v712_v27 = vld [vmem:[#allocation7 + $0x30] sm:$0xff]   ;;  %v716_v31 = vld [vmem:[#allocation7 + $0x38] sm:$0xff]   ;;  %v78_v40 = vpack.c.bf16 %v76_v38, %v76_v38  ;;  %v717_v41 = vld [vmem:[#allocation8] sm:$0xff]  }
  0x55   :  { %630 = vmatpush3.bf16.msra.mxu1 %v696_v11  ;;  %609 = vmatprep.subr.bf16.mxu0 %v697_v12  ;;  %v81_v32 = vld [vmem:[#allocation5 + $0x8] sm:$0xff]  ;;  %v80_v34 = vld [vmem:[#allocation5] sm:$0xff]  ;;  %v718_v42 = vld [vmem:[#allocation8 + $0x8] sm:$0xff]  }
  0x56   :  { %631 = vmatprep.subr.bf16.mxu1 %v698_v13  ;;  %v83_v35 = vpack.c.bf16 %v81_v32, %v81_v32  ;;  %v82_v37 = vpack.c.bf16 %v80_v34, %v80_v34  ;;  %413 = vmatprep.mubr.bf16.mxu1 %v79_v36  ;;  %v719_v43 = vld [vmem:[#allocation8 + $0x10] sm:$0xff]   ;;  %v720_v44 = vld [vmem:[#allocation8 + $0x18] sm:$0xff]   ;;  %v721_v45 = vld [vmem:[#allocation8 + $0x20] sm:$0xff]  }
  0x57   :  { %v722_v46 = vld [vmem:[#allocation8 + $0x28] sm:$0xff]   ;;  %v723_v47 = vld [vmem:[#allocation8 + $0x30] sm:$0xff]   ;;  %v724_v48 = vld [vmem:[#allocation8 + $0x38] sm:$0xff]  }
  0x58   :  { %610 = vmatpush3.bf16.msra.mxu0 %v699_v14  ;;  %277 = vmatprep.mubr.bf16.mxu0 %v83_v35  ;;  %v593_v57 = vld [vmem:[%s956_s3] ss:$0 sm:$0xff]  ;;  %s813_s3 = scalar_lea.vmem %s551_s23, 128 }
  0x59   :  { %632 = vmatpush3.bf16.msra.mxu1 %v700_v15  ;;  %611 = vmatprep.subr.bf16.mxu0 %v701_v16  ;;  %v594_v1 = vld [vmem:[%s958_s5] ss:$0 sm:$0xff]  ;;  %p814_p4 = scmp.ne.s32.totalorder %s551_s23, %s813_s3  ;;  %p819_p6 = scmp.lt.s32.totalorder %s813_s3, %s813_s3 }
  0x5a   :  { %633 = vmatprep.subr.bf16.mxu1 %v702_v17 }
  0x5b   :  { %p820_p7 = por %p819_p6, %p818_p5 }
  0x5c   :  { %612 = vmatpush3.bf16.msra.mxu0 %v703_v18 }
  0x5d   :  { %634 = vmatpush3.bf16.msra.mxu1 %v704_v19  ;;  %613 = vmatprep.subr.bf16.mxu0 %v705_v20  ;;  %p821_p8 = pnand %p820_p7, %p814_p4 }
  0x5e   :  { %635 = vmatprep.subr.bf16.mxu1 %v706_v21 }
  0x60   :  { %614 = vmatpush3.bf16.msra.mxu0 %v707_v22 }
  0x61   :  { %636 = vmatpush3.bf16.msra.mxu1 %v708_v23  ;;  %615 = vmatprep.subr.bf16.mxu0 %v709_v24 }
  0x62   :  { %637 = vmatprep.subr.bf16.mxu1 %v710_v25 }
  0x64   :  { %616 = vmatpush3.bf16.msra.mxu0 %v711_v26 }
  0x65   :  { %638 = vmatpush3.bf16.msra.mxu1 %v712_v27  ;;  %617 = vmatprep.subr.bf16.mxu0 %v713_v28 }
  0x66   :  { %639 = vmatprep.subr.bf16.mxu1 %v714_v29 }
  0x68   :  { %618 = vmatpush3.bf16.msra.mxu0 %v715_v30 }
  0x69   :  { %640 = vmatpush3.bf16.msra.mxu1 %v716_v31  ;;  %656 = vmatprep.subr.bf16.mxu0 %v849_v39 }
  0x6b   :  { %278 = vmatmul.mubr.bf16.vlgmr.msra.gmra.mrb[0].mxu0 %v82_v37 }
  0x6c   :  { %414 = vmatmul.mubr.bf16.vlgmr.msra.gmra.mrb[0].mxu1 %v78_v40  ;;  %657 = vmatpush3.bf16.msra.mxu0 %v717_v41 }
  0x6d   :  { %658 = vmatprep.subr.bf16.mxu0 %v849_v39  ;;  %672 = vmatprep.mubr.msk.bf16.mxu0 %vm850_vm0, %v849_v39 }
  0x70   :  { %659 = vmatpush3.bf16.msra.mxu0 %v718_v42 }
  0x71   :  { %660 = vmatprep.subr.bf16.mxu0 %v849_v39 }
  0x74   :  { %661 = vmatpush3.bf16.msra.mxu0 %v719_v43 }
  0x75   :  { %662 = vmatprep.subr.bf16.mxu0 %v849_v39 }
  0x78   :  { %663 = vmatpush3.bf16.msra.mxu0 %v720_v44 }
  0x79   :  { %664 = vmatprep.subr.bf16.mxu0 %v849_v39 }
  0x7c   :  { %665 = vmatpush3.bf16.msra.mxu0 %v721_v45 }
  0x7d   :  { %666 = vmatprep.subr.bf16.mxu0 %v849_v39 }
  0x80   :  { %667 = vmatpush3.bf16.msra.mxu0 %v722_v46 }
  0x81   :  { %668 = vmatprep.subr.bf16.mxu0 %v849_v39 }
  0x84   :  { %669 = vmatpush3.bf16.msra.mxu0 %v723_v47 }
  0x85   :  { %670 = vmatprep.subr.bf16.mxu0 %v849_v39 }
  0x88   :  { %671 = vmatpush3.bf16.msra.mxu0 %v724_v48 }
 0x13e   :  { %v619_v49 = vpop.f32.mrb[0].mxu0 }
 0x13f   :  { %v641_v50 = vpop.f32.mrb[0].mxu1  ;;  %v620_v51 = vpop.f32.mrb[1].mxu0 }
 0x140   :  { %v642_v52 = vpop.f32.mrb[1].mxu1  ;;  %v621_v53 = vadd.f32 %v620_v51, %v619_v49  ;;  %v622_v55 = vpop.f32.mrb[2].mxu0 }
 0x141   :  { %v643_v54 = vadd.f32 %v642_v52, %v641_v50  ;;  %v644_v56 = vpop.f32.mrb[2].mxu1  ;;  %v623_v58 = vpop.f32.mrb[3].mxu0 }
 0x142   :  { %v645_v59 = vpop.f32.mrb[3].mxu1 }
 0x143   :  { %v416_v60 = vadd.f32 %v643_v54, %v621_v53 }
 0x145   :  { %v428_v61 = vadd.f32 %v593_v57, %v416_v60 }
 0x147   :  { %v429_v62 = vmul.f32 0.01, %v428_v61 }
 0x149   :  { %v430_v63 = vmax.f32 %v428_v61, %v429_v62 }
 0x14b   :  { %v431_v0 = vpack.c.bf16 %v430_v63, %v430_v63 }
 0x14d   :  { %673 = vmatmul.mubr.bf16.vlgmr.msra.gmra.mrb[4].mxu0 %v431_v0 }
 0x220   :  { %v537_v2 = vpop.f32.mrb[4].mxu0 }
 0x221   :  { %v538_v3 = vadd.f32 %v594_v1, %v537_v2  ;;  %v674_v4 = vpop.f32.mrb[5].mxu0 }
 0x222   :  { %v540_v5 = vpop.f32.mrb[6].mxu0 }
 0x223   :  { %543 = vst [vmem:[#allocation10] sm:$0xff] %v538_v3  ;;  %v675_v6 = vpop.f32.mrb[7].mxu0 }
 0x224   :  { %824 = shalt.err (!%p821_p8)
}
 0x225   :  { %s825_s5 = scalar_lea.hbm %s959_s6, 128 }
 0x226   :  { %p826_p9 = scmp.ne.s32.totalorder %s959_s6, %s825_s5  ;;  %p829_p10 = scmp.lt.u32.totalorder %s825_s5, %s959_s6 }
 0x228   :  { %p831_p11 = pnand %p829_p10, %p826_p9 }
 0x22a   :  { %834 = shalt.err (!%p831_p11)
}
 0x22b   :  { %553 = dma.vmem_to_hbm [thread:$0]  %s551_s23, 128, %s959_s6, [#allocation4]  }
 0x22c   :  { %841 = dma.done.wait [#allocation4], 128  }
 0x22d   :  { %842 = vsyncadd [#allocation4], 4294967168 }
 0x22e   :  { %557 = vsyncpa [#allocation3], 1 }
 0x22f   :  { %558 = vsyncpa [#allocation6], 1 }
 0x230   :  { %559 = vsyncpa [#allocation9], 1 }
 0x231   :  { %560 = vsyncpa [#allocation4], 1 }

</bundles_post_ra>
